<compile_context>
chip_gen: v5e
topology: v5e:2x2
jax: 0.10.0
libtpu: 0.0.40
codegen_flags: <defaults>
</compile_context>

<pallas_src>
import jax
import jax.numpy as jnp
from jax.experimental import pallas as pl
from jax.experimental.pallas import tpu as pltpu


def _round_up(x, m):
    return ((x + m - 1) // m) * m


def mean_predict_kernel(pattern_ref, graph_ref, w_ref, b_ref, out_ref):
    """One batch tile of the MeanPredictNet forward.

    pattern_ref: (TB, Np, Dp)   graph_ref: (TB, Ng, Dg)
    w_ref (packed weight buffer, row blocks, all offsets 8-aligned):
        [0 : Dp]        p_layer weight^T              (Dp, H)
        [Dp : Dp+Dg]    g_layer weight^T              (Dg, H)
        next H rows     W1a' = W1[0:H]  - W1[2H:3H]   (H, H)
        next H rows     W1b' = W1[H:2H] + W1[2H:3H]   (H, H)
        next H rows     W1d  = W1[3H:4H]              (H, H)
        last H rows     [pred_mean^T | pred_var^T | 0] (H, H), lanes 0:2 live
    b_ref (packed bias buffer): (4, H) rows = bp, bg, b1, [bm, bv, 0...]
    out_ref: (TB, 2) = [mean | var]
    """
    dp = pattern_ref.shape[2]
    dg = graph_ref.shape[2]
    h = b_ref.shape[1]

    # torch.mean over the node dimension, per sample (sublane reduce -> XLU).
    pat_mean = jnp.mean(pattern_ref[...], axis=1)            # (TB, Dp)
    gra_mean = jnp.mean(graph_ref[...], axis=1)              # (TB, Dg)

    o = 0
    wp = w_ref[o:o + dp, :]; o += dp
    wg = w_ref[o:o + dg, :]; o += dg
    w1a = w_ref[o:o + h, :]; o += h
    w1b = w_ref[o:o + h, :]; o += h
    w1d = w_ref[o:o + h, :]; o += h
    wmv = w_ref[o:o + h, :]

    # p = p_layer(mean(pattern)); g = mean(g_layer(graph)) == g_layer(mean(graph)).
    p = jnp.dot(pat_mean, wp, preferred_element_type=jnp.float32) + b_ref[0:1, :]
    g = jnp.dot(gra_mean, wg, preferred_element_type=jnp.float32) + b_ref[1:2, :]

    # pred_layer1(cat([p, g, g-p, g*p], -1)) with the pre-folded W1 -> 3 matmuls.
    z = (jnp.dot(p, w1a, preferred_element_type=jnp.float32)
         + jnp.dot(g, w1b, preferred_element_type=jnp.float32)
         + jnp.dot(g * p, w1d, preferred_element_type=jnp.float32)
         + b_ref[2:3, :])
    y = jnp.maximum(z, 0.0)                                   # ReLU, (TB, H)

    # Fused pred_mean / pred_var head: one matmul, one store (lanes 0:1 = mean, var).
    head = jnp.dot(y, wmv, preferred_element_type=jnp.float32) + b_ref[3:4, :]
    out_ref[...] = head[:, 0:2]


def _pack_params(params, pattern_dim, graph_dim, hidden_dim):
    """Pack the 10 weight/bias arrays into one weight buffer and one bias buffer."""
    h = hidden_dim
    assert h >= 8 and h % 8 == 0, "hidden_dim must be a multiple of 8 for 8-aligned slices"
    dp_pad = _round_up(pattern_dim, 8)
    dg_pad = _round_up(graph_dim, 8)

    wp = jnp.pad(params["wp_t"], ((0, dp_pad - pattern_dim), (0, 0)))
    wg = jnp.pad(params["wg_t"], ((0, dg_pad - graph_dim), (0, 0)))
    w1 = params["w1_t"]                                  # (4H, H): rows = [p | g | g-p | g*p]
    w1a = w1[0:h] - w1[2 * h:3 * h]                      # static fold of the (g - p) block
    w1b = w1[h:2 * h] + w1[2 * h:3 * h]
    w1d = w1[3 * h:4 * h]
    wmv = jnp.pad(jnp.concatenate([params["wm_t"], params["wv_t"]], axis=1),
                  ((0, 0), (0, h - 2)))                  # (H, H), lanes 0:2 live
    w_all = jnp.concatenate([wp, wg, w1a, w1b, w1d, wmv], axis=0).astype(jnp.float32)

    bmv = jnp.pad(jnp.concatenate([params["bm"], params["bv"]], axis=1),
                  ((0, 0), (0, h - 2)))                  # (1, H)
    b_all = jnp.concatenate([params["bp"], params["bg"], params["b1"], bmv],
                            axis=0).astype(jnp.float32)  # (4, H)
    return w_all, b_all, dp_pad, dg_pad


def mean_predict_net(pattern, graph, params):
    """Forward pass. Accepts a single sample (Np, Dp)/(Ng, Dg) (module semantics) or a
    batch (B, Np, Dp)/(B, Ng, Dg) of independent problems processed in one kernel call."""
    single = pattern.ndim == 2
    if single:
        pattern = pattern[None]
        graph = graph[None]
    assert pattern.ndim == 3 and graph.ndim == 3 and pattern.shape[0] == graph.shape[0]

    b, n_pat, dp = pattern.shape
    _, n_gra, dg = graph.shape
    h = params["bp"].shape[-1]

    w_all, b_all, dp_pad, dg_pad = _pack_params(params, dp, dg, h)

    pattern = jnp.pad(pattern.astype(jnp.float32), ((0, 0), (0, 0), (0, dp_pad - dp)))
    graph = jnp.pad(graph.astype(jnp.float32), ((0, 0), (0, 0), (0, dg_pad - dg)))

    # Batch tile: fold B into the sublane / matmul-M dimension, one grid step per tile.
    tb = 128 if b > 128 else _round_up(b, 8)
    b_pad = _round_up(b, tb)
    if b_pad != b:
        pattern = jnp.pad(pattern, ((0, b_pad - b), (0, 0), (0, 0)))
        graph = jnp.pad(graph, ((0, b_pad - b), (0, 0), (0, 0)))

    out = pl.pallas_call(
        mean_predict_kernel,
        grid=(b_pad // tb,),
        in_specs=[
            pl.BlockSpec((tb, n_pat, dp_pad), lambda i: (i, 0, 0)),
            pl.BlockSpec((tb, n_gra, dg_pad), lambda i: (i, 0, 0)),
            pl.BlockSpec(w_all.shape, lambda i: (0, 0)),   # weights resident across tiles
            pl.BlockSpec(b_all.shape, lambda i: (0, 0)),
        ],
        out_specs=pl.BlockSpec((tb, 2), lambda i: (i, 0)),
        out_shape=jax.ShapeDtypeStruct((b_pad, 2), jnp.float32),
        compiler_params=pltpu.CompilerParams(dimension_semantics=("parallel",)),
    )(pattern, graph, w_all, b_all)

    mean = out[:b, 0:1]
    var = out[:b, 1:2]
    return mean, var


def init_params(key, pattern_dim, graph_dim, hidden_dim):
    """Deterministic synthetic init mirroring BasePoolPredictNet.__init__ shapes."""
    k = jax.random.split(key, 5)
    std = 1.0 / hidden_dim ** 0.5
    wp = jax.random.normal(k[0], (hidden_dim, pattern_dim), jnp.float32) * std
    wg = jax.random.normal(k[1], (hidden_dim, graph_dim), jnp.float32) * std
    w1 = jax.random.normal(k[2], (hidden_dim, 4 * hidden_dim), jnp.float32) * std
    bound = (6.0 / hidden_dim) ** 0.5  # kaiming_uniform_(nonlinearity='relu')
    wm = jax.random.uniform(k[3], (1, hidden_dim), jnp.float32, -bound, bound)
    wv = jax.random.uniform(k[4], (1, hidden_dim), jnp.float32, -bound, bound)
    return {
        "wp_t": wp.T, "bp": jnp.zeros((1, hidden_dim), jnp.float32),
        "wg_t": wg.T, "bg": jnp.zeros((1, hidden_dim), jnp.float32),
        "w1_t": w1.T, "b1": jnp.zeros((1, hidden_dim), jnp.float32),
        "wm_t": wm.T, "bm": jnp.zeros((1, 1), jnp.float32),
        "wv_t": wv.T, "bv": jnp.zeros((1, 1), jnp.float32),
    }


def reference(pattern, graph, params):
    """Pure-JAX batched reference matching MeanPredictNet.forward (dropout=0)."""
    if pattern.ndim == 2:
        pattern, graph = pattern[None], graph[None]
    p = jnp.mean(pattern, axis=1) @ params["wp_t"] + params["bp"]        # (B, H)
    g = jnp.mean(graph @ params["wg_t"] + params["bg"], axis=1)          # (B, H)
    z = jnp.concatenate([p, g, g - p, g * p], axis=1)
    y = jnp.maximum(z @ params["w1_t"] + params["b1"], 0.0)
    return (y @ params["wm_t"] + params["bm"],
            y @ params["wv_t"] + params["bv"])


if __name__ == "__main__":
    pattern_dim, graph_dim, hidden_dim = 16, 16, 32
    n_pattern, n_graph, batch = 8, 8, 8

    key = jax.random.PRNGKey(0)
    k_par, k_pat, k_gra = jax.random.split(key, 3)
    params = init_params(k_par, pattern_dim, graph_dim, hidden_dim)
    pattern = jax.random.normal(k_pat, (batch, n_pattern, pattern_dim), jnp.float32)
    graph = jax.random.normal(k_gra, (batch, n_graph, graph_dim), jnp.float32)

    # Batched call: B independent forward passes in one pallas_call.
    mean_out, var_out = mean_predict_net(pattern, graph, params)
    jax.block_until_ready((mean_out, var_out))

    ref_mean, ref_var = reference(pattern, graph, params)
    assert mean_out.shape == (batch, 1) and var_out.shape == (batch, 1)
    assert jnp.allclose(mean_out, ref_mean, atol=1e-4, rtol=1e-4), (mean_out, ref_mean)
    assert jnp.allclose(var_out, ref_var, atol=1e-4, rtol=1e-4), (var_out, ref_var)

    # Single-sample call (original module signature); padded to a full sublane tile inside.
    m1, v1 = mean_predict_net(pattern[0], graph[0], params)
    jax.block_until_ready((m1, v1))
    assert m1.shape == (1, 1) and v1.shape == (1, 1)
    assert jnp.allclose(m1, ref_mean[0:1], atol=1e-4, rtol=1e-4)
    assert jnp.allclose(v1, ref_var[0:1], atol=1e-4, rtol=1e-4)

    print("KERNEL_OK")
</pallas_src>

<mosaic_0001>
module attributes {stable_mosaic.version = 11 : i64} {
  func.func @mean_predict_kernel(%arg0: i32, %arg1: memref<8x8x16xf32, #tpu.memory_space<vmem>>, %arg2: memref<8x8x16xf32, #tpu.memory_space<vmem>>, %arg3: memref<160x32xf32, #tpu.memory_space<vmem>>, %arg4: memref<4x32xf32, #tpu.memory_space<vmem>>, %arg5: memref<8x2xf32, #tpu.memory_space<vmem>>) attributes {dimension_semantics = [#tpu.dimension_semantics<parallel>], iteration_bounds = array<i64: 1>, scalar_prefetch = 0 : i64, scratch_operands = 0 : i64, tpu.core_type = #tpu.core_type<tc>, window_params = [{transform_indices = @transform_0, window_bounds = array<i64: 8, 8, 16>}, {transform_indices = @transform_1, window_bounds = array<i64: 8, 8, 16>}, {pipeline_mode = #tpu.pipeline_mode<synchronous>, transform_indices = @transform_2, window_bounds = array<i64: 160, 32>}, {pipeline_mode = #tpu.pipeline_mode<synchronous>, transform_indices = @transform_3, window_bounds = array<i64: 4, 32>}, {transform_indices = @transform_4, window_bounds = array<i64: 8, 2>}]} {
    %c0 = arith.constant 0 : index
    %c0_0 = arith.constant 0 : index
    %c0_1 = arith.constant 0 : index
    %0 = vector.load %arg1[%c0, %c0_0, %c0_1] : memref<8x8x16xf32, #tpu.memory_space<vmem>>, vector<8x8x16xf32>
    %cst = arith.constant dense<0.000000e+00> : vector<8x16xf32>
    %1 = vector.multi_reduction <add>, %0, %cst [1] : vector<8x8x16xf32> to vector<8x16xf32>
    %cst_2 = arith.constant 8.000000e+00 : f32
    %2 = vector.broadcast %cst_2 : f32 to vector<8x16xf32>
    %3 = arith.divf %1, %2 : vector<8x16xf32>
    %c0_3 = arith.constant 0 : index
    %c0_4 = arith.constant 0 : index
    %c0_5 = arith.constant 0 : index
    %4 = vector.load %arg2[%c0_3, %c0_4, %c0_5] : memref<8x8x16xf32, #tpu.memory_space<vmem>>, vector<8x8x16xf32>
    %cst_6 = arith.constant dense<0.000000e+00> : vector<8x16xf32>
    %5 = vector.multi_reduction <add>, %4, %cst_6 [1] : vector<8x8x16xf32> to vector<8x16xf32>
    %cst_7 = arith.constant 8.000000e+00 : f32
    %6 = vector.broadcast %cst_7 : f32 to vector<8x16xf32>
    %7 = arith.divf %5, %6 : vector<8x16xf32>
    %c0_8 = arith.constant 0 : index
    %c0_9 = arith.constant 0 : index
    %8 = vector.load %arg3[%c0_8, %c0_9] : memref<160x32xf32, #tpu.memory_space<vmem>>, vector<16x32xf32>
    %c16 = arith.constant 16 : index
    %c0_10 = arith.constant 0 : index
    %9 = vector.load %arg3[%c16, %c0_10] : memref<160x32xf32, #tpu.memory_space<vmem>>, vector<16x32xf32>
    %c32 = arith.constant 32 : index
    %c0_11 = arith.constant 0 : index
    %10 = vector.load %arg3[%c32, %c0_11] : memref<160x32xf32, #tpu.memory_space<vmem>>, vector<32x32xf32>
    %c64 = arith.constant 64 : index
    %c0_12 = arith.constant 0 : index
    %11 = vector.load %arg3[%c64, %c0_12] : memref<160x32xf32, #tpu.memory_space<vmem>>, vector<32x32xf32>
    %c96 = arith.constant 96 : index
    %c0_13 = arith.constant 0 : index
    %12 = vector.load %arg3[%c96, %c0_13] : memref<160x32xf32, #tpu.memory_space<vmem>>, vector<32x32xf32>
    %c128 = arith.constant 128 : index
    %c0_14 = arith.constant 0 : index
    %13 = vector.load %arg3[%c128, %c0_14] : memref<160x32xf32, #tpu.memory_space<vmem>>, vector<32x32xf32>
    %cst_15 = arith.constant dense<0.000000e+00> : vector<8x32xf32>
    %14 = tpu.matmul %3, %8, %cst_15 {dimension_numbers = #tpu.dot_dimension_numbers<[1], [0], [0], [1], [0, 0, 1, 1], [], []>} : vector<8x16xf32>, vector<16x32xf32>, vector<8x32xf32> -> vector<8x32xf32>
    %c0_16 = arith.constant 0 : index
    %c0_17 = arith.constant 0 : index
    %15 = vector.load %arg4[%c0_16, %c0_17] : memref<4x32xf32, #tpu.memory_space<vmem>>, vector<1x32xf32>
    %16 = vector.broadcast %15 : vector<1x32xf32> to vector<8x32xf32>
    %17 = arith.addf %14, %16 : vector<8x32xf32>
    %cst_18 = arith.constant dense<0.000000e+00> : vector<8x32xf32>
    %18 = tpu.matmul %7, %9, %cst_18 {dimension_numbers = #tpu.dot_dimension_numbers<[1], [0], [0], [1], [0, 0, 1, 1], [], []>} : vector<8x16xf32>, vector<16x32xf32>, vector<8x32xf32> -> vector<8x32xf32>
    %c1 = arith.constant 1 : index
    %c0_19 = arith.constant 0 : index
    %19 = vector.load %arg4[%c1, %c0_19] : memref<4x32xf32, #tpu.memory_space<vmem>>, vector<1x32xf32>
    %20 = vector.broadcast %19 : vector<1x32xf32> to vector<8x32xf32>
    %21 = arith.addf %18, %20 : vector<8x32xf32>
    %cst_20 = arith.constant dense<0.000000e+00> : vector<8x32xf32>
    %22 = tpu.matmul %17, %10, %cst_20 {dimension_numbers = #tpu.dot_dimension_numbers<[1], [0], [0], [1], [0, 0, 1, 1], [], []>} : vector<8x32xf32>, vector<32x32xf32>, vector<8x32xf32> -> vector<8x32xf32>
    %cst_21 = arith.constant dense<0.000000e+00> : vector<8x32xf32>
    %23 = tpu.matmul %21, %11, %cst_21 {dimension_numbers = #tpu.dot_dimension_numbers<[1], [0], [0], [1], [0, 0, 1, 1], [], []>} : vector<8x32xf32>, vector<32x32xf32>, vector<8x32xf32> -> vector<8x32xf32>
    %24 = arith.addf %22, %23 : vector<8x32xf32>
    %25 = arith.mulf %21, %17 : vector<8x32xf32>
    %cst_22 = arith.constant dense<0.000000e+00> : vector<8x32xf32>
    %26 = tpu.matmul %25, %12, %cst_22 {dimension_numbers = #tpu.dot_dimension_numbers<[1], [0], [0], [1], [0, 0, 1, 1], [], []>} : vector<8x32xf32>, vector<32x32xf32>, vector<8x32xf32> -> vector<8x32xf32>
    %27 = arith.addf %24, %26 : vector<8x32xf32>
    %c2 = arith.constant 2 : index
    %c0_23 = arith.constant 0 : index
    %28 = vector.load %arg4[%c2, %c0_23] : memref<4x32xf32, #tpu.memory_space<vmem>>, vector<1x32xf32>
    %29 = vector.broadcast %28 : vector<1x32xf32> to vector<8x32xf32>
    %30 = arith.addf %27, %29 : vector<8x32xf32>
    %cst_24 = arith.constant 0.000000e+00 : f32
    %31 = vector.broadcast %cst_24 : f32 to vector<8x32xf32>
    %32 = arith.maximumf %30, %31 : vector<8x32xf32>
    %cst_25 = arith.constant dense<0.000000e+00> : vector<8x32xf32>
    %33 = tpu.matmul %32, %13, %cst_25 {dimension_numbers = #tpu.dot_dimension_numbers<[1], [0], [0], [1], [0, 0, 1, 1], [], []>} : vector<8x32xf32>, vector<32x32xf32>, vector<8x32xf32> -> vector<8x32xf32>
    %c3 = arith.constant 3 : index
    %c0_26 = arith.constant 0 : index
    %34 = vector.load %arg4[%c3, %c0_26] : memref<4x32xf32, #tpu.memory_space<vmem>>, vector<1x32xf32>
    %35 = vector.broadcast %34 : vector<1x32xf32> to vector<8x32xf32>
    %36 = arith.addf %33, %35 : vector<8x32xf32>
    %37 = vector.extract_strided_slice %36 {offsets = [0, 0], sizes = [8, 2], strides = [1, 1]} : vector<8x32xf32> to vector<8x2xf32>
    %c0_27 = arith.constant 0 : index
    %c0_28 = arith.constant 0 : index
    %38 = vector.load %arg5[%c0_27, %c0_28] : memref<8x2xf32, #tpu.memory_space<vmem>>, vector<8x2xf32>
    tpu.vector_store %arg5[%c0_27, %c0_28], %37 {strides = array<i32>} : memref<8x2xf32, #tpu.memory_space<vmem>>, vector<8x2xf32>,
    return
  }
  func.func @transform_0(%arg0: i32) -> (i32, i32, i32) {
    %c0_i32 = arith.constant 0 : i32
    %c0_i32_0 = arith.constant 0 : i32
    %c0_i32_1 = arith.constant 0 : i32
    return %arg0, %c0_i32, %c0_i32_0 : i32, i32, i32
  }
  func.func @transform_1(%arg0: i32) -> (i32, i32, i32) {
    %c0_i32 = arith.constant 0 : i32
    %c0_i32_0 = arith.constant 0 : i32
    %c0_i32_1 = arith.constant 0 : i32
    return %arg0, %c0_i32, %c0_i32_0 : i32, i32, i32
  }
  func.func @transform_2(%arg0: i32) -> (i32, i32) {
    %c0_i32 = arith.constant 0 : i32
    %c0_i32_0 = arith.constant 0 : i32
    %c0_i32_1 = arith.constant 0 : i32
    return %c0_i32, %c0_i32_0 : i32, i32
  }
  func.func @transform_3(%arg0: i32) -> (i32, i32) {
    %c0_i32 = arith.constant 0 : i32
    %c0_i32_0 = arith.constant 0 : i32
    %c0_i32_1 = arith.constant 0 : i32
    return %c0_i32, %c0_i32_0 : i32, i32
  }
  func.func @transform_4(%arg0: i32) -> (i32, i32) {
    %c0_i32 = arith.constant 0 : i32
    %c0_i32_0 = arith.constant 0 : i32
    return %arg0, %c0_i32 : i32, i32
  }
}

</mosaic_0001>

<bundles_post_ra>
// kernel: tpu_custom_call.1
= control target key start
LH: loop header
LB: loop body
LE: loop exit
PB: predicated region body
PF: predicated region fallthrough
CT: control target
= control target key end

     0   :  { %vm25_vm0 = vcmask 130048   ;;  %v394_v17 = vmov 8.0   ;;  %vm199_vm2 = vcmask 1041409   ;;  %vm201_vm3 = vcmask 1042434   ;;  %s615_s2 = inlined_call_operand.vmem [shape: f32[160,32], index: 2, kind: input, shape index: {}]   ;;  %s616_s0 = inlined_call_operand.vmem [shape: f32[8,8,16], index: 0, kind: input, shape index: {}]   ;;  %s617_s3 = inlined_call_operand.vmem [shape: f32[4,32], index: 3, kind: input, shape index: {}]   ;;  %s618_s1 = inlined_call_operand.vmem [shape: f32[8,8,16], index: 1, kind: input, shape index: {}]   ;;  %s619_s4 = inlined_call_operand.vmem [shape: f32[8,2], index: 4, kind: output, shape index: {}]  }
   0x1   :  { %v170_v0 = vld [vmem:[%s615_s2 + $0x8] sm:$0xff]  ;;  %v172_v1 = vld [vmem:[%s615_s2 + $0x18] sm:$0xff]  ;;  %v169_v2 = vld [vmem:[%s615_s2] sm:$0xff]  ;;  %392 = vrcp.f32 %v394_v17  ;;  %vm203_vm4 = vcmask 1043459   ;;  %vm205_vm5 = vcmask 1044484   ;;  %vm207_vm6 = vcmask 1045509  }
   0x2   :  { %229 = vmatpush.msra.mxu0 %v170_v0  ;;  %268 = vmatpush.msra.mxu1 %v172_v1  ;;  %v171_v3 = vld [vmem:[%s615_s2 + $0x10] sm:$0xff]  ;;  %v17_v4 = vld [vmem:[%s616_s0] sm:$0xff]  ;;  %v18_v5 = vld [vmem:[%s616_s0 + $0x8] sm:$0xff]  ;;  %vm209_vm7 = vcmask 1046534   ;;  %vm211_vm8 = vcmask 1047559   ;;  %vm274_vm9 = vcmask 261120  }
   0x3   :  { %v19_v6 = vld [vmem:[%s616_s0 + $0x10] sm:$0xff]  ;;  %v20_v7 = vld [vmem:[%s616_s0 + $0x18] sm:$0xff]  ;;  %v21_v8 = vld [vmem:[%s616_s0 + $0x20] sm:$0xff]  ;;  %v26_v9 = vsel %vm25_vm0, %v17_v4, 0.0  ;;  %v33_v10 = vsel %vm25_vm0, %v18_v5, 0.0  ;;  %vm375_vm10 = vcmask 15360  }
   0x4   :  { %230 = vmatpush.msra.mxu0 %v169_v2  ;;  %269 = vmatpush.msra.mxu1 %v171_v3  ;;  %v22_v11 = vld [vmem:[%s616_s0 + $0x28] sm:$0xff]  ;;  %v23_v12 = vld [vmem:[%s616_s0 + $0x30] sm:$0xff]  ;;  %v24_v13 = vld [vmem:[%s616_s0 + $0x38] sm:$0xff]  ;;  %v27_v14 = vrot.slane %v26_v9, 4  ;;  %v34_v15 = vrot.slane %v33_v10, 4  ;;  %v40_v16 = vsel %vm25_vm0, %v19_v6, 0.0 }
   0x5   :  { %v41_v18 = vrot.slane %v40_v16, 4  ;;  %v47_v19 = vsel %vm25_vm0, %v20_v7, 0.0  ;;  %v54_v20 = vsel %vm25_vm0, %v21_v8, 0.0  ;;  %v61_v21 = vsel %vm25_vm0, %v22_v11, 0.0  ;;  %v97_v59 = vld [vmem:[%s618_s1] sm:$0xff]  ;;  %v98_v0 = vld [vmem:[%s618_s1 + $0x8] sm:$0xff] }
   0x6   :  { %v28_v22 = vadd.f32 %v27_v14, %v26_v9  ;;  %v35_v23 = vadd.f32 %v34_v15, %v33_v10  ;;  %v48_v24 = vrot.slane %v47_v19, 4  ;;  %v55_v25 = vrot.slane %v54_v20, 4  ;;  %v99_v1 = vld [vmem:[%s618_s1 + $0x10] sm:$0xff]  ;;  %v100_v5 = vld [vmem:[%s618_s1 + $0x18] sm:$0xff]  ;;  %v101_v6 = vld [vmem:[%s618_s1 + $0x20] sm:$0xff] }
   0x7   :  { %v42_v26 = vadd.f32 %v41_v18, %v40_v16  ;;  %v62_v27 = vrot.slane %v61_v21, 4  ;;  %v68_v28 = vsel %vm25_vm0, %v23_v12, 0.0  ;;  %v75_v29 = vsel %vm25_vm0, %v24_v13, 0.0  ;;  %v464_v38 = vpop.eup %392  ;;  %v180_v11 = vld [vmem:[%s615_s2 + $0x58] sm:$0xff]  ;;  %v179_v13 = vld [vmem:[%s615_s2 + $0x50] sm:$0xff] }
   0x8   :  { %v29_v30 = vrot.slane %v28_v22, 2  ;;  %v36_v31 = vrot.slane %v35_v23, 2  ;;  %v49_v32 = vadd.f32 %v48_v24, %v47_v19  ;;  %v56_v33 = vadd.f32 %v55_v25, %v54_v20  ;;  %v176_v12 = vld [vmem:[%s615_s2 + $0x38] sm:$0xff]  ;;  %290 = vmatpush.msra.mxu2 %v180_v11  ;;  %v175_v18 = vld [vmem:[%s615_s2 + $0x30] sm:$0xff] }
   0x9   :  { %v43_v34 = vrot.slane %v42_v26, 2  ;;  %v63_v35 = vadd.f32 %v62_v27, %v61_v21  ;;  %v69_v36 = vrot.slane %v68_v28, 4  ;;  %v76_v37 = vrot.slane %v75_v29, 4  ;;  %313 = vmatpush.msra.mxu3 %v176_v12  ;;  %v184_v19 = vld [vmem:[%s615_s2 + $0x78] sm:$0xff] }
   0xa   :  { %v30_v39 = vadd.f32 %v29_v30, %v28_v22  ;;  %v37_v40 = vadd.f32 %v36_v31, %v35_v23  ;;  %v50_v41 = vrot.slane %v49_v32, 2  ;;  %v57_v42 = vrot.slane %v56_v33, 2  ;;  %v102_v22 = vld [vmem:[%s618_s1 + $0x28] sm:$0xff]  ;;  %v103_v23 = vld [vmem:[%s618_s1 + $0x30] sm:$0xff]  ;;  %337 = vmatpush.msrb.mxu0 %v184_v19  ;;  %291 = vmatpush.msra.mxu2 %v179_v13 }
   0xb   :  { %v44_v43 = vadd.f32 %v43_v34, %v42_v26  ;;  %v64_v44 = vrot.slane %v63_v35, 2  ;;  %v70_v45 = vadd.f32 %v69_v36, %v68_v28  ;;  %v77_v46 = vadd.f32 %v76_v37, %v75_v29  ;;  %314 = vmatpush.msra.mxu3 %v175_v18 }
   0xc   :  { %v31_v47 = vrot.slane %v30_v39, 1  ;;  %v38_v48 = vrot.slane %v37_v40, 1  ;;  %v51_v49 = vadd.f32 %v50_v41, %v49_v32  ;;  %v58_v50 = vadd.f32 %v57_v42, %v56_v33 }
   0xd   :  { %v45_v51 = vrot.slane %v44_v43, 1  ;;  %v65_v52 = vadd.f32 %v64_v44, %v63_v35  ;;  %v71_v53 = vrot.slane %v70_v45, 2  ;;  %v78_v54 = vrot.slane %v77_v46, 2 }
   0xe   :  { %v466_v55 = vadd.f32 %v31_v47, %v30_v39  ;;  %v468_v56 = vadd.f32 %v38_v48, %v37_v40  ;;  %v52_v57 = vrot.slane %v51_v49, 1  ;;  %v59_v58 = vrot.slane %v58_v50, 1 }
   0xf   :  { %v473_v60 = vadd.f32 %v45_v51, %v44_v43  ;;  %v66_v61 = vrot.slane %v65_v52, 1  ;;  %v72_v62 = vadd.f32 %v71_v53, %v70_v45  ;;  %v79_v63 = vadd.f32 %v78_v54, %v77_v46 }
  0x10   :  { %v53_v2 = vadd.f32 %v52_v57, %v51_v49  ;;  %v60_v3 = vadd.f32 %v59_v58, %v58_v50  ;;  %v83_v4 = vmul.f32 8.0, %v464_v38  ;;  %vm87_vm1 = vweird.f32 %v464_v38 }
  0x11   :  { %v67_v7 = vadd.f32 %v66_v61, %v65_v52  ;;  %v73_v8 = vrot.slane %v72_v62, 1  ;;  %v80_v9 = vrot.slane %v79_v63, 1  ;;  %v105_v10 = vsel %vm25_vm0, %v97_v59, 0.0 }
  0x12   :  { %v84_v14 = vsub.f32 1.0, %v83_v4  ;;  %v106_v15 = vrot.slane %v105_v10, 4  ;;  %v112_v16 = vsel %vm25_vm0, %v98_v0, 0.0  ;;  %v119_v17 = vsel %vm25_vm0, %v99_v1, 0.0 }
  0x13   :  { %v74_v20 = vadd.f32 %v73_v8, %v72_v62  ;;  %v81_v21 = vadd.f32 %v80_v9, %v79_v63  ;;  %v113_v24 = vrot.slane %v112_v16, 4  ;;  %v120_v25 = vrot.slane %v119_v17, 4 }
  0x14   :  { %v85_v26 = vmul.f32 %v464_v38, %v84_v14  ;;  %v107_v27 = vadd.f32 %v106_v15, %v105_v10  ;;  %v126_v28 = vsel %vm25_vm0, %v100_v5, 0.0  ;;  %v133_v29 = vsel %vm25_vm0, %v101_v6, 0.0 }
  0x15   :  { %v114_v30 = vadd.f32 %v113_v24, %v112_v16  ;;  %v121_v31 = vadd.f32 %v120_v25, %v119_v17  ;;  %v127_v32 = vrot.slane %v126_v28, 4  ;;  %v134_v33 = vrot.slane %v133_v29, 4 }
  0x16   :  { %v86_v34 = vadd.f32 %v464_v38, %v85_v26  ;;  %v108_v35 = vrot.slane %v107_v27, 2  ;;  %v140_v36 = vsel %vm25_vm0, %v102_v22, 0.0  ;;  %v147_v37 = vsel %vm25_vm0, %v103_v23, 0.0 }
  0x17   :  { %v115_v39 = vrot.slane %v114_v30, 2  ;;  %v122_v40 = vrot.slane %v121_v31, 2  ;;  %v128_v41 = vadd.f32 %v127_v32, %v126_v28  ;;  %v135_v42 = vadd.f32 %v134_v33, %v133_v29 }
  0x18   :  { %v522_v43 = vsel %vm87_vm1, %v464_v38, %v86_v34  ;;  %v109_v44 = vadd.f32 %v108_v35, %v107_v27  ;;  %v141_v45 = vrot.slane %v140_v36, 4  ;;  %v148_v46 = vrot.slane %v147_v37, 4 }
  0x19   :  { %v89_v47 = vmul.f32 %v522_v43, %v466_v55  ;;  %v90_v48 = vmul.f32 %v522_v43, %v468_v56  ;;  %v91_v49 = vmul.f32 %v522_v43, %v473_v60  ;;  %v92_v50 = vmul.f32 %v522_v43, %v53_v2 }
  0x1a   :  { %v93_v51 = vmul.f32 %v522_v43, %v60_v3  ;;  %v94_v52 = vmul.f32 %v522_v43, %v67_v7  ;;  %v95_v38 = vmul.f32 %v522_v43, %v74_v20  ;;  %v96_v53 = vmul.f32 %v522_v43, %v81_v21  ;;  %v104_v3 = vld [vmem:[%s618_s1 + $0x38] sm:$0xff] }
  0x1b   :  { %v200_v54 = vsel %vm199_vm2, %v90_v48, %v89_v47  ;;  %v110_v57 = vrot.slane %v109_v44, 1  ;;  %v116_v55 = vadd.f32 %v115_v39, %v114_v30  ;;  %v123_v58 = vadd.f32 %v122_v40, %v121_v31  ;;  %v178_v48 = vld [vmem:[%s615_s2 + $0x48] sm:$0xff] }
  0x1c   :  { %v202_v56 = vsel %vm201_vm3, %v91_v49, %v200_v54  ;;  %v129_v59 = vrot.slane %v128_v41, 2  ;;  %v136_v61 = vrot.slane %v135_v42, 2  ;;  %v142_v60 = vadd.f32 %v141_v45, %v140_v36  ;;  %v174_v49 = vld [vmem:[%s615_s2 + $0x28] sm:$0xff]  ;;  %292 = vmatpush.msra.mxu2 %v178_v48 }
  0x1d   :  { %v204_v62 = vsel %vm203_vm4, %v92_v50, %v202_v56  ;;  %v111_v63 = vadd.f32 %v110_v57, %v109_v44  ;;  %v117_v0 = vrot.slane %v116_v55, 1  ;;  %v124_v1 = vrot.slane %v123_v58, 1  ;;  %v183_v50 = vld [vmem:[%s615_s2 + $0x70] sm:$0xff]  ;;  %315 = vmatpush.msra.mxu3 %v174_v49 }
  0x1e   :  { %v206_v2 = vsel %vm205_vm5, %v93_v51, %v204_v62  ;;  %v130_v4 = vadd.f32 %v129_v59, %v128_v41  ;;  %v137_v5 = vadd.f32 %v136_v61, %v135_v42  ;;  %v143_v6 = vrot.slane %v142_v60, 2  ;;  %338 = vmatpush.msrb.mxu0 %v183_v50  ;;  %v173_v51 = vld [vmem:[%s615_s2 + $0x20] sm:$0xff]  ;;  %v188_v61 = vld [vmem:[%s615_s2 + $0x98] sm:$0xff]  ;;  %v186_v62 = vld [vmem:[%s615_s2 + $0x88] sm:$0xff] }
  0x1f   :  { %v208_v7 = vsel %vm207_vm6, %v94_v52, %v206_v2  ;;  %v118_v8 = vadd.f32 %v117_v0, %v116_v55  ;;  %v125_v9 = vadd.f32 %v124_v1, %v123_v58  ;;  %v149_v10 = vadd.f32 %v148_v46, %v147_v37  ;;  %v182_v52 = vld [vmem:[%s615_s2 + $0x68] sm:$0xff]  ;;  %316 = vmatpush.msra.mxu3 %v173_v51  ;;  %v389_v55 = vld [vmem:[%s617_s3 + $0x1] ss:$0 sm:$0xff] }
  0x20   :  { %v210_v11 = vsel %vm209_vm7, %v95_v38, %v208_v7  ;;  %v131_v12 = vrot.slane %v130_v4, 1  ;;  %v138_v13 = vrot.slane %v137_v5, 1  ;;  %v144_v14 = vadd.f32 %v143_v6, %v142_v60  ;;  %339 = vmatpush.msrb.mxu0 %v182_v52  ;;  %v181_v38 = vld [vmem:[%s615_s2 + $0x60] sm:$0xff]  ;;  %367 = vmatpush.msrb.mxu1 %v188_v61  ;;  %v187_v60 = vld [vmem:[%s615_s2 + $0x90] sm:$0xff] }
  0x21   :  { %v212_v15 = vsel %vm211_vm8, %v96_v53, %v210_v11  ;;  %v150_v16 = vrot.slane %v149_v10, 2  ;;  %v154_v17 = vsel %vm25_vm0, %v104_v3, 0.0  ;;  %v161_v18 = vmul.f32 %v111_v63, %v522_v43  ;;  %v388_v53 = vld [vmem:[%s617_s3] ss:$0 sm:$0xff]  ;;  %v390_v3 = vld [vmem:[%s617_s3 + $0x2] ss:$0 sm:$0xff] }
  0x22   :  { %381 = vmatmul.msk.f32.vlgmr.msra.gmra.mxu0 %vm25_vm0, %v212_v15  ;;  %v132_v19 = vadd.f32 %v131_v12, %v130_v4  ;;  %v139_v20 = vadd.f32 %v138_v13, %v137_v5  ;;  %v145_v21 = vrot.slane %v144_v14, 1  ;;  %v155_v22 = vrot.slane %v154_v17, 4  ;;  %368 = vmatpush.msrb.mxu1 %v187_v60  ;;  %v185_v63 = vld [vmem:[%s615_s2 + $0x80] sm:$0xff] }
  0x23   :  { %v151_v23 = vadd.f32 %v150_v16, %v149_v10  ;;  %v162_v24 = vmul.f32 %v118_v8, %v522_v43  ;;  %v163_v25 = vmul.f32 %v125_v9, %v522_v43  ;;  %340 = vmatpush.msrb.mxu0 %v181_v38  ;;  %v391_v8 = vld [vmem:[%s617_s3 + $0x3] ss:$0 sm:$0xff] }
  0x24   :  { %v146_v26 = vadd.f32 %v145_v21, %v144_v14  ;;  %v156_v27 = vadd.f32 %v155_v22, %v154_v17  ;;  %v164_v28 = vmul.f32 %v132_v19, %v522_v43  ;;  %v165_v29 = vmul.f32 %v139_v20, %v522_v43  ;;  %369 = vmatpush.msrb.mxu1 %v186_v62 }
  0x25   :  { %v152_v30 = vrot.slane %v151_v23, 1  ;;  %v245_v31 = vsel %vm199_vm2, %v162_v24, %v161_v18 }
  0x26   :  { %v157_v32 = vrot.slane %v156_v27, 2  ;;  %v166_v33 = vmul.f32 %v146_v26, %v522_v43  ;;  %v246_v34 = vsel %vm201_vm3, %v163_v25, %v245_v31  ;;  %370 = vmatpush.msrb.mxu1 %v185_v63 }
  0x27   :  { %v153_v35 = vadd.f32 %v152_v30, %v151_v23  ;;  %v247_v36 = vsel %vm203_vm4, %v164_v28, %v246_v34 }
  0x28   :  { %v158_v37 = vadd.f32 %v157_v32, %v156_v27  ;;  %v248_v39 = vsel %vm205_vm5, %v165_v29, %v247_v36 }
  0x29   :  { %v167_v40 = vmul.f32 %v153_v35, %v522_v43  ;;  %v249_v42 = vsel %vm207_vm6, %v166_v33, %v248_v39 }
  0x2a   :  { %v159_v41 = vrot.slane %v158_v37, 1 }
  0x2b   :  { %v250_v45 = vsel %vm209_vm7, %v167_v40, %v249_v42 }
  0x2c   :  { %v160_v44 = vadd.f32 %v159_v41, %v158_v37 }
  0x2e   :  { %v168_v46 = vmul.f32 %v160_v44, %v522_v43  ;;  %v177_v43 = vld [vmem:[%s615_s2 + $0x40] sm:$0xff] }
  0x2f   :  { %293 = vmatpush.msra.mxu2 %v177_v43 }
  0x30   :  { %v251_v47 = vsel %vm211_vm8, %v168_v46, %v250_v45 }
  0x31   :  { %382 = vmatmul.msk.f32.vlgmr.msra.gmra.mxu1 %vm25_vm0, %v251_v47 }
  0x9f   :  { %v232_v54 = vpop.f32.mrf.mxu0 }
  0xa0   :  { %v233_v57 = vadd.f32 %v388_v53, %v232_v54 }
  0xa2   :  { %384 = vmatmul.msk.f32.vlgmr.msra.gmra.mxu3 %vm274_vm9, %v233_v57 }
  0xae   :  { %v271_v58 = vpop.f32.mrf.mxu1 }
  0xaf   :  { %v272_v56 = vadd.f32 %v389_v55, %v271_v58 }
  0xb1   :  { %v321_v59 = vmul.f32 %v272_v56, %v233_v57  ;;  %383 = vmatmul.msk.f32.vlgmr.msra.gmra.mxu2 %vm274_vm9, %v272_v56 }
  0xb3   :  { %385 = vmatmul.msk.f32.vlgmr.msrb.gmra.mxu0 %vm274_vm9, %v321_v59 }
 0x125   :  { %v318_v0 = vpop.f32.mrf.mxu3 }
 0x130   :  { %v342_v4 = vpop.f32.mrf.mxu0 }
 0x134   :  { %v295_v1 = vpop.f32.mrf.mxu2 }
 0x135   :  { %v319_v2 = vadd.f32 %v318_v0, %v295_v1 }
 0x137   :  { %v345_v5 = vadd.f32 %v342_v4, %v319_v2 }
 0x139   :  { %v348_v6 = vadd.f32 %v390_v3, %v345_v5 }
 0x13b   :  { %v349_v7 = vmax.f32 %v348_v6, 0.0 }
 0x13d   :  { %386 = vmatmul.msk.f32.vlgmr.msrb.gmra.mxu1 %vm274_vm9, %v349_v7 }
 0x1ba   :  { %v372_v9 = vpop.f32.mrf.mxu1 }
 0x1bb   :  { %v373_v10 = vadd.f32 %v391_v8, %v372_v9 }
 0x1bd   :  { %376 = vst.msk [vmem:[%s619_s4] sm:$0xff] %vm375_vm10, %v373_v10 }

</bundles_post_ra>
